<compile_context>
chip_gen: v7x
topology: tpu7x:2x2x1
jax: 0.10.0
libtpu: 0.0.40
codegen_flags: <defaults>
</compile_context>

<pallas_src>
import functools

import jax
import jax.numpy as jnp
from jax.experimental import pallas as pl
from jax.experimental.pallas import tpu as pltpu


def _round_up(x, m):
    return ((x + m - 1) // m) * m


# --------------------------------- kernel -----------------------------------


def _make_qlinear_kernel(use_bf16_matmul):
    qdtype = jnp.bfloat16 if use_bf16_matmul else jnp.int8

    def kernel(x_ref, qw_ref, wscale_ref, bias_ref, out_ref, qinp_ref, iscale_ref):
        # x_ref:      (tm, K)  input dtype    activation tile (resident across j)
        # qw_ref:     (K,  tn) int8 | bf16    pre-transposed (+pre-cast) weight tile
        # wscale_ref: (1,  tn) float32        per-output-channel weight scales
        # bias_ref:   (1,  tn) float32
        # out_ref:    (tm, tn) out dtype
        # qinp_ref:   (tm, K)  int8 | bf16    quantized activations (scratch)
        # iscale_ref: (tm, 1)  float32        per-row activation scales (scratch)

        # --- qntz(inp, is_a=True): once per M tile, reused across all N tiles ---
        # Invariant: grid axis 1 is sequential ("arbitrary") and starts at 0;
        # do NOT mark it parallel/core_parallel or quantization is skipped.
        # TODO(synk): for narrow-N layers, ping-pong qinp/iscale scratch and
        # quantize tile i+1 during the last j of tile i to hide this burst.
        @pl.when(pl.program_id(1) == 0)
        def _():
            x = x_ref[...].astype(jnp.float32)
            absmax = jnp.max(jnp.abs(x), axis=-1, keepdims=True)          # (tm, 1)
            safe = jnp.where(absmax == 0.0, 1.0, absmax)
            inv = 127.0 / safe                                            # per-row reciprocal
            q = jnp.clip(jnp.round(x * inv), -127.0, 127.0)
            qinp_ref[...] = q.astype(qdtype)
            iscale_ref[...] = absmax * (1.0 / 127.0)                      # iparams scale

        # --- aten._int_mm(qinp, qweight.t()) on this (tm, tn) output tile ---
        if use_bf16_matmul:
            # v7x MXU has no integer mode; int8 values/products are exact in bf16.
            # Weight was pre-cast to bf16 in HBM at init (no per-tile VPU cast).
            d = jnp.dot(qinp_ref[...], qw_ref[...],
                        preferred_element_type=jnp.float32)               # (tm, tn) f32
        else:
            d = jnp.dot(qinp_ref[...], qw_ref[...],
                        preferred_element_type=jnp.int32).astype(jnp.float32)

        # --- dqntz(d, iparams, wparams, bias) ---
        out_ref[...] = (d * iscale_ref[...] * wscale_ref[...]
                        + bias_ref[...]).astype(out_ref.dtype)

    return kernel


# ------------------------------ pallas_call ---------------------------------


@functools.partial(
    jax.jit,
    static_argnames=("block_m", "block_n", "use_bf16_matmul", "out_dtype",
                     "vmem_limit"))
def _qlinear_call(x2, qw_t, wscale2, bias2, *, block_m, block_n,
                  use_bf16_matmul, out_dtype, vmem_limit):
    Mp, K = x2.shape
    Np = qw_t.shape[1]
    tm, tn = block_m, block_n

    return pl.pallas_call(
        _make_qlinear_kernel(use_bf16_matmul),
        out_shape=jax.ShapeDtypeStruct((Mp, Np), out_dtype),
        grid_spec=pltpu.PrefetchScalarGridSpec(
            num_scalar_prefetch=0,
            grid=(Mp // tm, Np // tn),                       # N inner: x block stays resident
            in_specs=[
                pl.BlockSpec((tm, K), lambda i, j: (i, 0)),  # activations
                pl.BlockSpec((K, tn), lambda i, j: (0, j)),  # weight (K, N) tile
                pl.BlockSpec((1, tn), lambda i, j: (0, j)),  # weight scales
                pl.BlockSpec((1, tn), lambda i, j: (0, j)),  # bias
            ],
            out_specs=pl.BlockSpec((tm, tn), lambda i, j: (i, j)),
            scratch_shapes=[
                pltpu.VMEM((tm, K), jnp.bfloat16 if use_bf16_matmul else jnp.int8),
                pltpu.VMEM((tm, 1), jnp.float32),
            ],
        ),
        compiler_params=pltpu.CompilerParams(
            # N axis carries the hoisted quantization scratch -> "arbitrary".
            dimension_semantics=("parallel", "arbitrary"),
            vmem_limit_bytes=vmem_limit,
        ),
    )(x2, qw_t, wscale2, bias2)


# --------------------------- hardware / tiling -------------------------------


def _device_kind():
    try:
        return jax.devices()[0].device_kind.lower()
    except Exception:
        return ""


def _is_v7x(kind):
    return ("v7" in kind) or ("7x" in kind)


def _vmem_budget_bytes(is_v7x):
    phys = None
    try:
        phys = int(getattr(pltpu.get_tpu_info(), "vmem_capacity_bytes"))
    except Exception:
        phys = None
    if not phys or phys <= 0:
        phys = (64 if is_v7x else 128) * 1024 * 1024
    # ~20% headroom for compiler-internal scratch / semaphores:
    # ~102 MiB on v5e/v6e (128 MiB), ~51 MiB on v7x (64 MiB).
    return int(phys * 0.80)


def _estimate_vmem(tm, tn, K, x_bytes, w_bytes, q_bytes, out_bytes):
    return (2 * tm * K * x_bytes        # activation double buffer
            + 2 * K * tn * w_bytes      # weight double buffer
            + 2 * tm * tn * out_bytes   # output double buffer
            + 4 * tn * 4                # scale + bias buffers
            + tm * K * q_bytes          # qinp scratch
            + tm * 8)                   # iscale scratch


def _select_tiles(M, K, Np, x_bytes, w_bytes, q_bytes, out_bytes,
                  budget, two_m_tiles):
    # tn: lane-dense, a multiple of 128 dividing Np, capped at 512.
    tn = max(128, min(512, Np))
    while Np % tn != 0:
        tn -= 128

    tm_cap = _round_up(M, 8)
    if two_m_tiles and M > 8:
        # v7x megacore: make sure the "parallel" M axis has >= 2 tiles.
        tm_cap = min(tm_cap, max(8, _round_up((M + 1) // 2, 8)))

    # Pick the LARGEST tm that fits the VMEM budget: weight HBM re-streaming
    # scales as (M/tm)*N*K, so bigger tm is the main bandwidth lever.
    for tm in (1024, 768, 512, 384, 256, 192, 128, 64, 32, 16, 8):
        if tm > tm_cap:
            continue
        if _estimate_vmem(tm, tn, K, x_bytes, w_bytes, q_bytes, out_bytes) <= budget:
            return tm, tn
    return min(8, tm_cap), tn


# --------------------------------- module ------------------------------------


class QLinearPallas:
    """Pallas TPU implementation of protoquant QLinear.

    Weight-side preprocessing (transpose to (K, N), optional bf16 pre-cast on
    v7x, N padding to a multiple of 128, scale/bias reshape+cast) happens ONCE
    here and is cached, so the per-call forward only runs the fused kernel.
    """

    def __init__(self, qweight, w_scale, bias, minimize_error=False,
                 use_bf16_matmul=None, out_dtype=None):
        # TODO(synk): minimize_error=True has no clean closed form here;
        # round-half-to-even quantization is used regardless.
        N, K = qweight.shape
        kind = _device_kind()
        self.is_v7x = _is_v7x(kind)
        if use_bf16_matmul is None:
            # v7x MXU is bf16/fp8-only; v5e/v6e keep the 2x-throughput int8 path.
            use_bf16_matmul = self.is_v7x
        self.use_bf16_matmul = bool(use_bf16_matmul)
        self.N, self.K = N, K
        self.out_dtype = out_dtype

        Np = _round_up(N, 128)
        qw_t = qweight.T                                          # (K, N) int8
        if self.use_bf16_matmul:
            # One-time HBM pre-cast (2x weight bytes, fine at v7x's 3.2 TB/s);
            # removes the repeated per-tile int8->bf16 VPU cast in the kernel.
            qw_t = qw_t.astype(jnp.bfloat16)
        wscale2 = w_scale.reshape(1, N).astype(jnp.float32)
        bias2 = bias.reshape(1, N).astype(jnp.float32)
        if Np != N:
            # Lane-dense output width: padded columns produce zeros, sliced off.
            qw_t = jnp.pad(qw_t, ((0, 0), (0, Np - N)))
            wscale2 = jnp.pad(wscale2, ((0, 0), (0, Np - N)))
            bias2 = jnp.pad(bias2, ((0, 0), (0, Np - N)))
        self.Np = Np
        self.qw_t = jax.block_until_ready(qw_t)
        self.wscale2 = jax.block_until_ready(wscale2)
        self.bias2 = jax.block_until_ready(bias2)
        self._vmem_budget = _vmem_budget_bytes(self.is_v7x)

    def __call__(self, x):
        assert x.ndim == 3
        B, S, K = x.shape
        assert K == self.K
        M = B * S
        out_dtype = jnp.dtype(self.out_dtype if self.out_dtype is not None
                              else x.dtype)

        x_bytes = jnp.dtype(x.dtype).itemsize
        w_bytes = 2 if self.use_bf16_matmul else 1
        q_bytes = 2 if self.use_bf16_matmul else 1
        out_bytes = out_dtype.itemsize

        tm, tn = _select_tiles(M, K, self.Np, x_bytes, w_bytes, q_bytes,
                               out_bytes, self._vmem_budget,
                               two_m_tiles=self.is_v7x)
        est = _estimate_vmem(tm, tn, K, x_bytes, w_bytes, q_bytes, out_bytes)
        vmem_limit = int(min(self._vmem_budget,
                             max(32 * 1024 * 1024, 2 * est)))

        Mp = _round_up(M, tm)
        # Activations stay in their native dtype (no forced f32 HBM traffic);
        # upcast to f32 happens only inside the kernel for the quant math.
        x2 = x.reshape(M, K)
        if Mp != M:
            x2 = jnp.pad(x2, ((0, Mp - M), (0, 0)))   # zero rows quantize to zeros

        out = _qlinear_call(x2, self.qw_t, self.wscale2, self.bias2,
                            block_m=tm, block_n=tn,
                            use_bf16_matmul=self.use_bf16_matmul,
                            out_dtype=out_dtype, vmem_limit=vmem_limit)
        return out[:M, :self.N].reshape(B, S, self.N)


# --------------------------------- test ---------------------------------------


def _reference(x, qweight, w_scale, bias):
    B, S, K = x.shape
    x2 = x.reshape(B * S, K).astype(jnp.float32)
    absmax = jnp.max(jnp.abs(x2), axis=-1, keepdims=True)
    iscale = absmax / 127.0
    safe = jnp.where(iscale == 0.0, 1.0, iscale)
    qinp = jnp.clip(jnp.round(x2 / safe), -127.0, 127.0).astype(jnp.int32)
    d = qinp @ qweight.astype(jnp.int32).T
    out = d.astype(jnp.float32) * iscale * w_scale[None, :] + bias[None, :]
    return out.reshape(B, S, -1)


if __name__ == "__main__":
    # Small synthetic shapes consistent with the module:
    # in_features = out_features (the module derives both from qweight.size(1)).
    B, S, K = 2, 8, 32
    N = 32

    key = jax.random.PRNGKey(0)
    kx, kw, kb = jax.random.split(key, 3)

    # Deterministic "checkpoint": float weight -> per-row symmetric int8 quant.
    w_fp = jax.random.normal(kw, (N, K), dtype=jnp.float32)
    w_absmax = jnp.max(jnp.abs(w_fp), axis=-1, keepdims=True)      # (N, 1)
    w_scale = (w_absmax / 127.0).reshape(N)                        # wparams scales
    qweight = jnp.clip(jnp.round(w_fp / w_absmax * 127.0),
                       -127.0, 127.0).astype(jnp.int8)             # (N, K) int8
    bias = jax.random.normal(kb, (N,), dtype=jnp.float32)

    x = jax.random.normal(kx, (B, S, K), dtype=jnp.float32)

    layer = QLinearPallas(qweight, w_scale, bias, minimize_error=False)
    out = jax.block_until_ready(layer(x))

    ref = _reference(x, qweight, w_scale, bias)
    assert out.shape == (B, S, N), out.shape
    assert jnp.allclose(out, ref, atol=1e-4, rtol=1e-4), \
        float(jnp.max(jnp.abs(out - ref)))

    print("KERNEL_OK")
</pallas_src>

<mosaic_0001>
module attributes {stable_mosaic.version = 11 : i64} {
  func.func @kernel(%arg0: i32, %arg1: i32, %arg2: memref<16x32xf32, #tpu.memory_space<vmem>>, %arg3: memref<32x128xi8, #tpu.memory_space<vmem>>, %arg4: memref<1x128xf32, #tpu.memory_space<vmem>>, %arg5: memref<1x128xf32, #tpu.memory_space<vmem>>, %arg6: memref<16x128xf32, #tpu.memory_space<vmem>>, %arg7: memref<16x32xi8, #tpu.memory_space<vmem>>, %arg8: memref<16x1xf32, #tpu.memory_space<vmem>>) attributes {dimension_semantics = [#tpu.dimension_semantics<parallel>, #tpu.dimension_semantics<arbitrary>], iteration_bounds = array<i64: 1, 1>, scalar_prefetch = 0 : i64, scratch_operands = 2 : i64, tpu.core_type = #tpu.core_type<tc>, window_params = [{transform_indices = @transform_0, window_bounds = array<i64: 16, 32>}, {transform_indices = @transform_1, window_bounds = array<i64: 32, 128>}, {transform_indices = @transform_2, window_bounds = array<i64: 1, 128>}, {transform_indices = @transform_3, window_bounds = array<i64: 1, 128>}, {transform_indices = @transform_4, window_bounds = array<i64: 16, 128>}]} {
    %c0_i32 = arith.constant 0 : i32
    %0 = arith.cmpi eq, %arg1, %c0_i32 : i32
    %1 = arith.extui %0 : i1 to i32
    %c0_i32_0 = arith.constant 0 : i32
    %2 = arith.cmpi ne, %1, %c0_i32_0 : i32
    scf.if %2 {
      %c0_12 = arith.constant 0 : index
      %c0_13 = arith.constant 0 : index
      %17 = vector.load %arg2[%c0_12, %c0_13] : memref<16x32xf32, #tpu.memory_space<vmem>>, vector<16x32xf32>
      %18 = math.absf %17 : vector<16x32xf32>
      %cst_14 = arith.constant dense<0xFF800000> : vector<16xf32>
      %19 = vector.multi_reduction <maximumf>, %18, %cst_14 [1] : vector<16x32xf32> to vector<16xf32>
      %20 = vector.shape_cast %19 : vector<16xf32> to vector<16x1xf32>
      %cst_15 = arith.constant 0.000000e+00 : f32
      %21 = vector.broadcast %cst_15 : f32 to vector<16x1xf32>
      %22 = arith.cmpf oeq, %20, %21 : vector<16x1xf32>
      %cst_16 = arith.constant 1.000000e+00 : f32
      %23 = vector.broadcast %cst_16 : f32 to vector<16x1xf32>
      %24 = arith.select %22, %23, %20 : vector<16x1xi1>, vector<16x1xf32>
      %cst_17 = arith.constant 1.270000e+02 : f32
      %25 = vector.broadcast %cst_17 : f32 to vector<16x1xf32>
      %26 = arith.divf %25, %24 : vector<16x1xf32>
      %27 = vector.broadcast %26 : vector<16x1xf32> to vector<16x32xf32>
      %28 = arith.mulf %17, %27 : vector<16x32xf32>
      %29 = math.roundeven %28 : vector<16x32xf32>
      %cst_18 = arith.constant -1.270000e+02 : f32
      %cst_19 = arith.constant 1.270000e+02 : f32
      %30 = vector.broadcast %cst_18 : f32 to vector<16x32xf32>
      %31 = arith.maximumf %30, %29 : vector<16x32xf32>
      %32 = vector.broadcast %cst_19 : f32 to vector<16x32xf32>
      %33 = arith.minimumf %32, %31 : vector<16x32xf32>
      %34 = arith.fptosi %33 : vector<16x32xf32> to vector<16x32xi8>
      %c0_20 = arith.constant 0 : index
      %c0_21 = arith.constant 0 : index
      %35 = vector.load %arg7[%c0_20, %c0_21] : memref<16x32xi8, #tpu.memory_space<vmem>>, vector<16x32xi8>
      tpu.vector_store %arg7[%c0_20, %c0_21], %34 {strides = array<i32>} : memref<16x32xi8, #tpu.memory_space<vmem>>, vector<16x32xi8>,
      %cst_22 = arith.constant 0.00787401571 : f32
      %36 = vector.broadcast %cst_22 : f32 to vector<16x1xf32>
      %37 = arith.mulf %20, %36 : vector<16x1xf32>
      %c0_23 = arith.constant 0 : index
      %c0_24 = arith.constant 0 : index
      %38 = vector.load %arg8[%c0_23, %c0_24] : memref<16x1xf32, #tpu.memory_space<vmem>>, vector<16x1xf32>
      tpu.vector_store %arg8[%c0_23, %c0_24], %37 {strides = array<i32>} : memref<16x1xf32, #tpu.memory_space<vmem>>, vector<16x1xf32>,
    } else {
    }
    %c0 = arith.constant 0 : index
    %c0_1 = arith.constant 0 : index
    %3 = vector.load %arg7[%c0, %c0_1] : memref<16x32xi8, #tpu.memory_space<vmem>>, vector<16x32xi8>
    %c0_2 = arith.constant 0 : index
    %c0_3 = arith.constant 0 : index
    %4 = vector.load %arg3[%c0_2, %c0_3] : memref<32x128xi8, #tpu.memory_space<vmem>>, vector<32x128xi8>
    %cst = arith.constant dense<0> : vector<16x128xi32>
    %5 = tpu.matmul %3, %4, %cst {dimension_numbers = #tpu.dot_dimension_numbers<[1], [0], [0], [1], [0, 0, 1, 1], [], []>} : vector<16x32xi8>, vector<32x128xi8>, vector<16x128xi32> -> vector<16x128xi32>
    %6 = arith.sitofp %5 : vector<16x128xi32> to vector<16x128xf32>
    %c0_4 = arith.constant 0 : index
    %c0_5 = arith.constant 0 : index
    %7 = vector.load %arg8[%c0_4, %c0_5] : memref<16x1xf32, #tpu.memory_space<vmem>>, vector<16x1xf32>
    %8 = vector.broadcast %7 : vector<16x1xf32> to vector<16x128xf32>
    %9 = arith.mulf %6, %8 : vector<16x128xf32>
    %c0_6 = arith.constant 0 : index
    %c0_7 = arith.constant 0 : index
    %10 = vector.load %arg4[%c0_6, %c0_7] : memref<1x128xf32, #tpu.memory_space<vmem>>, vector<1x128xf32>
    %11 = vector.broadcast %10 : vector<1x128xf32> to vector<16x128xf32>
    %12 = arith.mulf %9, %11 : vector<16x128xf32>
    %c0_8 = arith.constant 0 : index
    %c0_9 = arith.constant 0 : index
    %13 = vector.load %arg5[%c0_8, %c0_9] : memref<1x128xf32, #tpu.memory_space<vmem>>, vector<1x128xf32>
    %14 = vector.broadcast %13 : vector<1x128xf32> to vector<16x128xf32>
    %15 = arith.addf %12, %14 : vector<16x128xf32>
    %c0_10 = arith.constant 0 : index
    %c0_11 = arith.constant 0 : index
    %16 = vector.load %arg6[%c0_10, %c0_11] : memref<16x128xf32, #tpu.memory_space<vmem>>, vector<16x128xf32>
    tpu.vector_store %arg6[%c0_10, %c0_11], %15 {strides = array<i32>} : memref<16x128xf32, #tpu.memory_space<vmem>>, vector<16x128xf32>,
    return
  }
  func.func @transform_0(%arg0: i32, %arg1: i32) -> (i32, i32) {
    %c0_i32 = arith.constant 0 : i32
    %c0_i32_0 = arith.constant 0 : i32
    return %arg0, %c0_i32 : i32, i32
  }
  func.func @transform_1(%arg0: i32, %arg1: i32) -> (i32, i32) {
    %c0_i32 = arith.constant 0 : i32
    %c0_i32_0 = arith.constant 0 : i32
    return %c0_i32, %arg1 : i32, i32
  }
  func.func @transform_2(%arg0: i32, %arg1: i32) -> (i32, i32) {
    %c0_i32 = arith.constant 0 : i32
    %c0_i32_0 = arith.constant 0 : i32
    return %c0_i32, %arg1 : i32, i32
  }
  func.func @transform_3(%arg0: i32, %arg1: i32) -> (i32, i32) {
    %c0_i32 = arith.constant 0 : i32
    %c0_i32_0 = arith.constant 0 : i32
    return %c0_i32, %arg1 : i32, i32
  }
  func.func @transform_4(%arg0: i32, %arg1: i32) -> (i32, i32) {
    %c0_i32 = arith.constant 0 : i32
    return %arg0, %arg1 : i32, i32
  }
}

</mosaic_0001>

<bundles_post_ra>
// kernel: _qlinear_call.1
= control target key start
LH: loop header
LB: loop body
LE: loop exit
PB: predicated region body
PF: predicated region fallthrough
CT: control target
= control target key end

     0   :  { %9 = vsyncpa [#allocation5], 0  ;;  %s405_s0 = inlined_call_operand.hbm [shape: f32[16,32], index: 0, kind: input, shape index: {}]   ;;  %s406_s1 = inlined_call_operand.hbm [shape: s8[32,128], index: 1, kind: input, shape index: {}]   ;;  %s407_s2 = inlined_call_operand.vmem [shape: f32[1,128], index: 2, kind: input, shape index: {}]   ;;  %s408_s3 = inlined_call_operand.vmem [shape: f32[1,128], index: 3, kind: input, shape index: {}]   ;;  %s409_s4 = inlined_call_operand.hbm [shape: f32[16,128], index: 4, kind: output, shape index: {}]  }
   0x1   :  { %10 = vsyncpa [#allocation8], 0 }
   0x2   :  { %11 = vsyncpa [#allocation6], 0  ;;  %s321_s15 = smov [#allocation4]   ;;  %s249_s19 = scalar_lea.hbm %s405_s0, 256 }
   0x3   :  { %s17_s16 = sshll.u32 %s321_s15, 4  ;;  %p250_p0 = scmp.ne.s32.totalorder %s405_s0, %s249_s19  ;;  %s18_s16 = int_to_ptr.vmem [resolvable:$true] %s17_s16 }
   0x4   :  { %p253_p1 = scmp.lt.u32.totalorder %s249_s19, %s405_s0 }
   0x6   :  { %p255_p2 = pnand %p253_p1, %p250_p0 }
   0x8   :  { %258 = shalt.err (!%p255_p2)
}
   0x9   :  { %s259_s24 = scalar_lea.vmem %s18_s16, 256  ;;  %p264_p4 = scmp.lt.s32.totalorder %s18_s16, %s18_s16 }
   0xa   :  { %p260_p3 = scmp.ne.s32.totalorder %s18_s16, %s259_s24  ;;  %p265_p5 = scmp.lt.s32.totalorder %s259_s24, %s259_s24 }
   0xc   :  { %p266_p6 = por %p265_p5, %p264_p4 }
   0xe   :  { %p267_p7 = pnand %p266_p6, %p260_p3 }
  0x10   :  { %270 = shalt.err (!%p267_p7)
}
  0x11   :  { %s322_s25 = smov 128   ;;  %s323_s26 = smov 8  }
  0x12   :  { %23 = dma.hbm_to_vmem [thread:$0]  %s405_s0, 256, %s18_s16, [#allocation5], %s322_s25, %s322_s25, %s323_s26  }
  0x13   :  { %s324_s29 = smov [#allocation7]   ;;  %s271_s7 = scalar_lea.hbm %s406_s1, 128 }
  0x14   :  { %s30_s30 = sshll.u32 %s324_s29, 4  ;;  %p272_p8 = scmp.ne.s32.totalorder %s406_s1, %s271_s7  ;;  %s31_s30 = int_to_ptr.vmem [resolvable:$true] %s30_s30 }
  0x15   :  { %p275_p9 = scmp.lt.u32.totalorder %s271_s7, %s406_s1 }
  0x17   :  { %p277_p10 = pnand %p275_p9, %p272_p8 }
  0x19   :  { %280 = shalt.err (!%p277_p10)
}
  0x1a   :  { %s281_s12 = scalar_lea.vmem %s31_s30, 128  ;;  %p286_p12 = scmp.lt.s32.totalorder %s31_s30, %s31_s30 }
  0x1b   :  { %p282_p11 = scmp.ne.s32.totalorder %s31_s30, %s281_s12  ;;  %p287_p13 = scmp.lt.s32.totalorder %s281_s12, %s281_s12 }
  0x1d   :  { %p288_p0 = por %p287_p13, %p286_p12 }
  0x1f   :  { %p289_p1 = pnand %p288_p0, %p282_p11 }
  0x21   :  { %292 = shalt.err (!%p289_p1)
}
  0x22   :  { %33 = dma.hbm_to_vmem [thread:$0]  %s406_s1, 128, %s31_s30, [#allocation8]  }
  0x23   :  { %315 = dma.done.wait [#allocation5], 256  }
  0x24   :  { %316 = vsyncadd [#allocation5], 4294967040 }
  0x25   :  { %317 = dma.done.wait [#allocation8], 128  }
  0x26   :  { %318 = vsyncadd [#allocation8], 4294967168  ;;  %v49_v0 = vld [vmem:[#allocation4] sm:$0xff]  ;;  %vm53_vm0 = vcmask 261120   ;;  %v50_v1 = vld [vmem:[#allocation4 + $0x8] sm:$0xff]  ;;  %v325_v6 = vmov 0  }
  0x27   :  { %v51_v2 = vand.u32 2147483647, %v49_v0  ;;  %v52_v3 = vand.u32 2147483647, %v50_v1  ;;  %243 = vset.pattern.permute.xlu1 %v325_v6  ;;  %244 = vset.pattern.permute.xlu0 %v325_v6  ;;  %v100_v7 = vld [vmem:[#allocation7] sm:$0xff]  ;;  %v326_v8 = vmov 0.0  }
  0x28   :  { %221 = vmatprep.subr.bf16.mxu0 %v326_v8  ;;  %v103_v9 = vunpack.c.l.s8.bf16 %v100_v7  ;;  %vm327_vm1 = vmmov 0   ;;  %v104_v10 = vunpack.c.h.s8.bf16 %v100_v7  ;;  %vm95_vm2 = vcmask 7168   ;;  %v216_v54 = vld [vmem:[%s407_s2] ss:$0 sm:$0xff]  ;;  %s328_s17 = smov [#allocation9]  }
  0x29   :  { %v54_v4 = vsel %vm53_vm0, %v51_v2, -inf  ;;  %v57_v5 = vsel %vm53_vm0, %v52_v3, -inf  ;;  %225 = vmatprep.mubr.msk.bf16.mxu0 %vm327_vm1, %v326_v8  ;;  %vm90_vm5 = vcmask 254976   ;;  %v217_v58 = vld [vmem:[%s408_s3] ss:$0 sm:$0xff]  ;;  %s199_s18 = sshll.u32 %s328_s17, 4  ;;  %s200_s18 = int_to_ptr.vmem [resolvable:$true] %s199_s18 }
  0x2a   :  { %55 = vmax.xlane.f32.xlu0 %v54_v4  ;;  %222 = vmatpush3.bf16.msra.mxu0 %v103_v9  ;;  %s293_s19 = scalar_lea.vmem %s200_s18, 256  ;;  %p298_p3 = scmp.lt.s32.totalorder %s200_s18, %s200_s18 }
  0x2b   :  { %223 = vmatprep.subr.bf16.mxu0 %v326_v8  ;;  %p294_p2 = scmp.ne.s32.totalorder %s200_s18, %s293_s19  ;;  %p299_p4 = scmp.lt.s32.totalorder %s293_s19, %s293_s19 }
  0x2d   :  { %p300_p5 = por %p299_p4, %p298_p3 }
  0x2e   :  { %58 = vmax.xlane.f32.xlu0 %v57_v5  ;;  %224 = vmatpush3.bf16.msra.mxu0 %v104_v10 }
  0x2f   :  { %p301_p6 = pnand %p300_p5, %p294_p2 }
  0xb7   :  { %v56_v11 = vpop.xlane.xlu0 %55 }
  0xb8   :  { %vm60_vm3 = vcmp.eq.f32.partialorder %v56_v11, 0.0  ;;  %v93_v12 = vmul.f32 0.007874016, %v56_v11 }
  0xb9   :  { %v62_v13 = vsel %vm60_vm3, 1.0, %v56_v11 }
  0xba   :  { %245 = vrcp.f32 %v62_v13  ;;  %96 = vst.msk [vmem:[#allocation3] sm:$0xff] %vm95_vm2, %v93_v12 }
  0xbb   :  { %v59_v14 = vpop.xlane.xlu0 %58 }
  0xbc   :  { %vm61_vm4 = vcmp.eq.f32.partialorder %v59_v14, 0.0  ;;  %v94_v15 = vmul.f32 0.007874016, %v59_v14 }
  0xbd   :  { %v63_v16 = vsel %vm61_vm4, 1.0, %v59_v14 }
  0xbe   :  { %247 = vrcp.f32 %v63_v16  ;;  %97 = vst.msk [vmem:[#allocation3 + $0x8] sm:$0xff] %vm95_vm2, %v94_v15 }
  0xc1   :  { %v160_v17 = vld [vmem:[#allocation3] sm:$0xff] }
  0xc2   :  { %164 = vperm.xlu1 %243, %v160_v17  }
  0xc4   :  { %v246_v18 = vpop.eup %245 }
  0xc5   :  { %v65_v19 = vmul.f32 127.0, %v246_v18  ;;  %v161_v20 = vld [vmem:[#allocation3 + $0x8] sm:$0xff] }
  0xc6   :  { %169 = vperm.xlu1 %243, %v161_v20  }
  0xc7   :  { %v68_v21 = vmul.f32 %v65_v19, %v49_v0 }
  0xc8   :  { %v248_v22 = vpop.eup %247 }
  0xc9   :  { %v229_v23 = vround.rtne.f32 %v68_v21  ;;  %v67_v24 = vmul.f32 127.0, %v248_v22 }
  0xcb   :  { %v69_v25 = vmul.f32 %v67_v24, %v50_v1  ;;  %v212_v26 = vclamps-f32 %v229_v23, 127.0 }
  0xcd   :  { %v230_v27 = vround.rtne.f32 %v69_v25  ;;  %v76_v29 = vtrunc.f32 %v212_v26 }
  0xcf   :  { %v213_v28 = vclamps-f32 %v230_v27, 127.0 }
  0xd1   :  { %v77_v30 = vtrunc.f32 %v213_v28 }
  0xd3   :  { %v78_v31 = vpack.c.f32.eXmY %v76_v29, %v77_v30, 312 }
  0xd5   :  { %v82_v32 = vpack.c.b8 %v78_v31, %v78_v31 }
  0xd7   :  { %v84_v33 = vunpack.c.0.s8 %v82_v32  ;;  %v85_v34 = vunpack.c.1.s8 %v82_v32 }
  0xd9   :  { %v86_v35 = vpack.c.b16 %v84_v33, %v84_v33  ;;  %v88_v36 = vpack.c.b16 %v85_v34, %v85_v34 }
  0xdb   :  { %v87_v37 = vpack.c.b8 %v86_v35, %v86_v35  ;;  %v89_v38 = vpack.c.b8 %v88_v36, %v88_v36 }
  0xdd   :  { %91 = vst.msk [vmem:[#allocation2] sm:$0x3] %vm90_vm5, %v87_v37  ;;  %92 = vst.msk [vmem:[#allocation2 + $0x2] sm:$0x3] %vm90_vm5, %v89_v38 }
  0xe4   :  { %v98_v39 = vld [vmem:[#allocation2] sm:$0x3]  ;;  %v99_v40 = vld [vmem:[#allocation2 + $0x2] sm:$0x3] }
  0xe5   :  { %v101_v41 = vunpack.c.l.s8.bf16 %v98_v39  ;;  %v102_v42 = vunpack.c.l.s8.bf16 %v99_v40 }
  0xe7   :  { %v214_v43 = vcombine.low %v101_v41, %v102_v42 }
  0xe9   :  { %226 = vmatmul.mubr.msk.bf16.vlgmr.msra.gmra.mrb[0].mxu0 %vm53_vm0, %v214_v43 }
 0x141   :  { %v165_v47 = vpop.permute.xlu1 %164 }
 0x145   :  { %v170_v57 = vpop.permute.xlu1 %169 }
 0x1bc   :  { %v149_v44 = vpop.f32.mrb[0].mxu0 }
 0x1bd   :  { %v231_v45 = vtrunc.f32 %v149_v44  ;;  %v227_v46 = vpop.f32.mrb[1].mxu0 }
 0x1be   :  { %v152_v48 = vpop.f32.mrb[2].mxu0 }
 0x1bf   :  { %v232_v49 = vcvt.f32.s32 %v231_v45  ;;  %v233_v50 = vtrunc.f32 %v152_v48  ;;  %v228_v51 = vpop.f32.mrb[3].mxu0 }
 0x1c1   :  { %v158_v52 = vcvt.s32.f32 %v232_v49  ;;  %v234_v53 = vcvt.f32.s32 %v233_v50 }
 0x1c3   :  { %v172_v55 = vmul.f32 %v165_v47, %v158_v52  ;;  %v159_v56 = vcvt.s32.f32 %v234_v53 }
 0x1c5   :  { %v181_v59 = vmul.f32 %v216_v54, %v172_v55  ;;  %v173_v60 = vmul.f32 %v170_v57, %v159_v56 }
 0x1c7   :  { %v182_v61 = vmul.f32 %v216_v54, %v173_v60  ;;  %v190_v62 = vadd.f32 %v217_v58, %v181_v59 }
 0x1c9   :  { %v191_v63 = vadd.f32 %v217_v58, %v182_v61  ;;  %192 = vst [vmem:[#allocation9] sm:$0xff] %v190_v62 }
 0x1cb   :  { %193 = vst [vmem:[#allocation9 + $0x8] sm:$0xff] %v191_v63 }
 0x1cc   :  { %304 = shalt.err (!%p301_p6)
}
 0x1cd   :  { %s305_s3 = scalar_lea.hbm %s409_s4, 256 }
 0x1ce   :  { %p306_p7 = scmp.ne.s32.totalorder %s409_s4, %s305_s3  ;;  %p309_p8 = scmp.lt.u32.totalorder %s305_s3, %s409_s4 }
 0x1d0   :  { %p311_p9 = pnand %p309_p8, %p306_p7 }
 0x1d2   :  { %314 = shalt.err (!%p311_p9)
}
 0x1d3   :  { %205 = dma.vmem_to_hbm [thread:$0]  %s200_s18, 256, %s409_s4, [#allocation6], %s322_s25, %s322_s25, %s323_s26  }
 0x1d4   :  { %319 = dma.done.wait [#allocation6], 256  }
 0x1d5   :  { %320 = vsyncadd [#allocation6], 4294967040 }
 0x1d6   :  { %209 = vsyncpa [#allocation5], 1 }
 0x1d7   :  { %210 = vsyncpa [#allocation8], 1 }
 0x1d8   :  { %211 = vsyncpa [#allocation6], 1 }

</bundles_post_ra>
